<compile_context>
chip_gen: v7x
topology: tpu7x:2x2x1
jax: 0.10.0
libtpu: 0.0.40
codegen_flags: <defaults>
</compile_context>

<pallas_src>
import jax
import jax.numpy as jnp
from jax.experimental import pallas as pl
from jax.experimental.pallas import tpu as pltpu

ACTION = 2
IN_DIM = 4
HIDDEN = 64
HPAD = 128          # lane-dense padded hidden width
MAX_TILE_B = 4096   # batch-tile cap (amortizes per-grid-step overhead)


def _round_up(x, m):
    return ((x + m - 1) // m) * m


def _mlp_kernel(x_ref, w1_ref, b1_ref, w2_ref, b2_ref, w3_ref, b3_ref, o_ref):
    # x: (tile_b, 4) f32 -> bf16 for the MXU; weights already bf16.
    x = x_ref[...].astype(jnp.bfloat16)

    # fc1 + ReLU  (f32 accumulation, f32 bias add)
    h1 = jnp.dot(x, w1_ref[...], preferred_element_type=jnp.float32) + b1_ref[...]
    h1 = jnp.maximum(h1, 0.0)

    # fc2 + ReLU
    h2 = jnp.dot(h1.astype(jnp.bfloat16), w2_ref[...],
                 preferred_element_type=jnp.float32) + b2_ref[...]
    h2 = jnp.maximum(h2, 0.0)

    # fc3 (no activation) -> narrow (tile_b, ACTION) store; only real columns
    # ever leave VMEM.
    o_ref[...] = (
        jnp.dot(h2.astype(jnp.bfloat16), w3_ref[...],
                preferred_element_type=jnp.float32) + b3_ref[...]
    ).astype(o_ref.dtype)


@jax.jit
def net_forward(x, params):
    """Fused MLP forward pass.  x: (batch, 4) f32 -> (batch, ACTION) f32."""
    w1, b1, w2, b2, w3, b3 = params
    batch = x.shape[0]

    # Pad batch only to the sublane multiple (8), not to a full tile.
    padded_b = _round_up(batch, 8)
    if padded_b != batch:
        x = jnp.pad(x, ((0, padded_b - batch), (0, 0)))

    # Tile selection: cap at MAX_TILE_B, but split anything bigger than one
    # sublane group into >= 2 grid steps so v7x's two TensorCores both get
    # work under dimension_semantics=("parallel",).
    if padded_b > 8:
        tile_b = min(MAX_TILE_B, _round_up(pl.cdiv(padded_b, 2), 8))
    else:
        tile_b = padded_b
    grid = (pl.cdiv(padded_b, tile_b),)   # partial last block handled by Pallas

    pinned = lambda i: (0, 0)   # weights / biases: same block every grid step
    out = pl.pallas_call(
        _mlp_kernel,
        out_shape=jax.ShapeDtypeStruct((padded_b, ACTION), jnp.float32),
        grid=grid,
        in_specs=[
            pl.BlockSpec((tile_b, IN_DIM), lambda i: (i, 0)),   # x
            pl.BlockSpec((IN_DIM, HPAD), pinned),               # w1 (4,128) bf16
            pl.BlockSpec((1, HPAD), pinned),                    # b1 (1,128) f32
            pl.BlockSpec((HPAD, HPAD), pinned),                 # w2 (128,128) bf16
            pl.BlockSpec((1, HPAD), pinned),                    # b2 (1,128) f32
            pl.BlockSpec((HPAD, ACTION), pinned),               # w3 (128,2) bf16
            pl.BlockSpec((1, ACTION), pinned),                  # b3 (1,2) f32
        ],
        out_specs=pl.BlockSpec((tile_b, ACTION), lambda i: (i, 0)),
        compiler_params=pltpu.CompilerParams(
            dimension_semantics=("parallel",),
            vmem_limit_bytes=32 * 1024 * 1024,
        ),
    )(x, w1, b1, w2, b2, w3, b3)

    # Leading-dim slice only (no strided last-dim slice anymore).
    return out[:batch]


# ----------------------------- init (PyTorch-equivalent) ---------------------

def _kaiming_normal(key, fan_in, fan_out):
    # PyTorch kaiming_normal_ default: mode='fan_in', a=0 -> std = sqrt(2/fan_in)
    std = jnp.sqrt(2.0 / fan_in)
    return jax.random.normal(key, (fan_in, fan_out), dtype=jnp.float32) * std


def _linear_bias(key, fan_in, fan_out):
    # PyTorch nn.Linear default bias init: U(-1/sqrt(fan_in), 1/sqrt(fan_in))
    bound = 1.0 / jnp.sqrt(jnp.float32(fan_in))
    return jax.random.uniform(
        key, (1, fan_out), dtype=jnp.float32, minval=-bound, maxval=bound
    )


def _pad_to(a, shape):
    pads = [(0, t - s) for s, t in zip(a.shape, shape)]
    return jnp.pad(a, pads)


def init_params(key):
    """Weights stored as (in, out); hidden dims zero-padded to 128; bf16 weights."""
    k1, k2, k3, k4, k5, k6 = jax.random.split(key, 6)
    w1 = _kaiming_normal(k1, IN_DIM, HIDDEN)      # (4, 64)
    b1 = _linear_bias(k2, IN_DIM, HIDDEN)         # (1, 64)
    w2 = _kaiming_normal(k3, HIDDEN, HIDDEN)      # (64, 64)
    b2 = _linear_bias(k4, HIDDEN, HIDDEN)         # (1, 64)
    w3 = _kaiming_normal(k5, HIDDEN, ACTION)      # (64, 2)
    b3 = _linear_bias(k6, HIDDEN, ACTION)         # (1, 2)

    w1p = _pad_to(w1, (IN_DIM, HPAD)).astype(jnp.bfloat16)   # (4, 128)
    b1p = _pad_to(b1, (1, HPAD))                              # (1, 128) f32
    w2p = _pad_to(w2, (HPAD, HPAD)).astype(jnp.bfloat16)      # (128, 128)
    b2p = _pad_to(b2, (1, HPAD))                              # (1, 128) f32
    w3p = _pad_to(w3, (HPAD, ACTION)).astype(jnp.bfloat16)    # (128, 2) - narrow
    b3p = b3                                                  # (1, 2) f32
    return (w1p, b1p, w2p, b2p, w3p, b3p)


# ----------------------------- pure-JAX reference ----------------------------

def net_forward_ref(x, params):
    """Reference mirroring the kernel's numeric path (bf16 matmuls, f32 acc)."""
    w1, b1, w2, b2, w3, b3 = params
    w1u, b1u = w1[:, :HIDDEN], b1[:, :HIDDEN]
    w2u, b2u = w2[:HIDDEN, :HIDDEN], b2[:, :HIDDEN]
    w3u, b3u = w3[:HIDDEN, :ACTION], b3[:, :ACTION]

    h1 = jnp.dot(x.astype(jnp.bfloat16), w1u,
                 preferred_element_type=jnp.float32) + b1u
    h1 = jnp.maximum(h1, 0.0)
    h2 = jnp.dot(h1.astype(jnp.bfloat16), w2u,
                 preferred_element_type=jnp.float32) + b2u
    h2 = jnp.maximum(h2, 0.0)
    return jnp.dot(h2.astype(jnp.bfloat16), w3u,
                   preferred_element_type=jnp.float32) + b3u


# TODO(synk): Net.get_action's epsilon-greedy sampling is host-side Python
# control flow (random.random / np.random.choice) and is intentionally not
# implemented as a kernel; only forward() is.

if __name__ == "__main__":
    key = jax.random.PRNGKey(0)
    pkey, xkey = jax.random.split(key)
    params = init_params(pkey)

    # Small CartPole-style batch (state dim = 4).
    batch = 8
    x = jax.random.normal(xkey, (batch, IN_DIM), dtype=jnp.float32)

    out = jax.block_until_ready(net_forward(x, params))
    ref = net_forward_ref(x, params)
    assert out.shape == (batch, ACTION), out.shape
    assert jnp.allclose(out, ref, atol=1e-4, rtol=1e-4), "mismatch vs reference"

    # Larger (training-style, non-multiple-of-8) batch: exercises the 2-step
    # grid and the partial final block.
    xkey2 = jax.random.fold_in(xkey, 1)
    x_big = jax.random.normal(xkey2, (1024 + 37, IN_DIM), dtype=jnp.float32)
    out_big = jax.block_until_ready(net_forward(x_big, params))
    ref_big = net_forward_ref(x_big, params)
    assert out_big.shape == (1024 + 37, ACTION), out_big.shape
    assert jnp.allclose(out_big, ref_big, atol=1e-4, rtol=1e-4), "big-batch mismatch"

    print("KERNEL_OK")
</pallas_src>

<mosaic_0001>
module attributes {stable_mosaic.version = 11 : i64} {
  func.func @_mlp_kernel(%arg0: i32, %arg1: memref<8x4xf32, #tpu.memory_space<vmem>>, %arg2: memref<4x128xbf16, #tpu.memory_space<vmem>>, %arg3: memref<1x128xf32, #tpu.memory_space<vmem>>, %arg4: memref<128x128xbf16, #tpu.memory_space<vmem>>, %arg5: memref<1x128xf32, #tpu.memory_space<vmem>>, %arg6: memref<128x2xbf16, #tpu.memory_space<vmem>>, %arg7: memref<1x2xf32, #tpu.memory_space<vmem>>, %arg8: memref<8x2xf32, #tpu.memory_space<vmem>>) attributes {dimension_semantics = [#tpu.dimension_semantics<parallel>], iteration_bounds = array<i64: 1>, scalar_prefetch = 0 : i64, scratch_operands = 0 : i64, tpu.core_type = #tpu.core_type<tc>, window_params = [{transform_indices = @transform_0, window_bounds = array<i64: 8, 4>}, {pipeline_mode = #tpu.pipeline_mode<synchronous>, transform_indices = @transform_1, window_bounds = array<i64: 4, 128>}, {pipeline_mode = #tpu.pipeline_mode<synchronous>, transform_indices = @transform_2, window_bounds = array<i64: 1, 128>}, {pipeline_mode = #tpu.pipeline_mode<synchronous>, transform_indices = @transform_3, window_bounds = array<i64: 128, 128>}, {pipeline_mode = #tpu.pipeline_mode<synchronous>, transform_indices = @transform_4, window_bounds = array<i64: 1, 128>}, {pipeline_mode = #tpu.pipeline_mode<synchronous>, transform_indices = @transform_5, window_bounds = array<i64: 128, 2>}, {pipeline_mode = #tpu.pipeline_mode<synchronous>, transform_indices = @transform_6, window_bounds = array<i64: 1, 2>}, {transform_indices = @transform_7, window_bounds = array<i64: 8, 2>}]} {
    %c0 = arith.constant 0 : index
    %c0_0 = arith.constant 0 : index
    %0 = vector.load %arg1[%c0, %c0_0] : memref<8x4xf32, #tpu.memory_space<vmem>>, vector<8x4xf32>
    %1 = arith.truncf %0 : vector<8x4xf32> to vector<8x4xbf16>
    %c0_1 = arith.constant 0 : index
    %c0_2 = arith.constant 0 : index
    %2 = vector.load %arg2[%c0_1, %c0_2] : memref<4x128xbf16, #tpu.memory_space<vmem>>, vector<4x128xbf16>
    %cst = arith.constant dense<0.000000e+00> : vector<8x128xf32>
    %3 = tpu.matmul %1, %2, %cst {dimension_numbers = #tpu.dot_dimension_numbers<[1], [0], [0], [1], [0, 0, 1, 1], [], []>} : vector<8x4xbf16>, vector<4x128xbf16>, vector<8x128xf32> -> vector<8x128xf32>
    %c0_3 = arith.constant 0 : index
    %c0_4 = arith.constant 0 : index
    %4 = vector.load %arg3[%c0_3, %c0_4] : memref<1x128xf32, #tpu.memory_space<vmem>>, vector<1x128xf32>
    %5 = vector.broadcast %4 : vector<1x128xf32> to vector<8x128xf32>
    %6 = arith.addf %3, %5 : vector<8x128xf32>
    %cst_5 = arith.constant 0.000000e+00 : f32
    %7 = vector.broadcast %cst_5 : f32 to vector<8x128xf32>
    %8 = arith.maximumf %6, %7 : vector<8x128xf32>
    %9 = arith.truncf %8 : vector<8x128xf32> to vector<8x128xbf16>
    %c0_6 = arith.constant 0 : index
    %c0_7 = arith.constant 0 : index
    %10 = vector.load %arg4[%c0_6, %c0_7] : memref<128x128xbf16, #tpu.memory_space<vmem>>, vector<128x128xbf16>
    %cst_8 = arith.constant dense<0.000000e+00> : vector<8x128xf32>
    %11 = tpu.matmul %9, %10, %cst_8 {dimension_numbers = #tpu.dot_dimension_numbers<[1], [0], [0], [1], [0, 0, 1, 1], [], []>} : vector<8x128xbf16>, vector<128x128xbf16>, vector<8x128xf32> -> vector<8x128xf32>
    %c0_9 = arith.constant 0 : index
    %c0_10 = arith.constant 0 : index
    %12 = vector.load %arg5[%c0_9, %c0_10] : memref<1x128xf32, #tpu.memory_space<vmem>>, vector<1x128xf32>
    %13 = vector.broadcast %12 : vector<1x128xf32> to vector<8x128xf32>
    %14 = arith.addf %11, %13 : vector<8x128xf32>
    %cst_11 = arith.constant 0.000000e+00 : f32
    %15 = vector.broadcast %cst_11 : f32 to vector<8x128xf32>
    %16 = arith.maximumf %14, %15 : vector<8x128xf32>
    %17 = arith.truncf %16 : vector<8x128xf32> to vector<8x128xbf16>
    %c0_12 = arith.constant 0 : index
    %c0_13 = arith.constant 0 : index
    %18 = vector.load %arg6[%c0_12, %c0_13] : memref<128x2xbf16, #tpu.memory_space<vmem>>, vector<128x2xbf16>
    %cst_14 = arith.constant dense<0.000000e+00> : vector<8x2xf32>
    %19 = tpu.matmul %17, %18, %cst_14 {dimension_numbers = #tpu.dot_dimension_numbers<[1], [0], [0], [1], [0, 0, 1, 1], [], []>} : vector<8x128xbf16>, vector<128x2xbf16>, vector<8x2xf32> -> vector<8x2xf32>
    %c0_15 = arith.constant 0 : index
    %c0_16 = arith.constant 0 : index
    %20 = vector.load %arg7[%c0_15, %c0_16] : memref<1x2xf32, #tpu.memory_space<vmem>>, vector<1x2xf32>
    %21 = vector.broadcast %20 : vector<1x2xf32> to vector<8x2xf32>
    %22 = arith.addf %19, %21 : vector<8x2xf32>
    %c0_17 = arith.constant 0 : index
    %c0_18 = arith.constant 0 : index
    %23 = vector.load %arg8[%c0_17, %c0_18] : memref<8x2xf32, #tpu.memory_space<vmem>>, vector<8x2xf32>
    tpu.vector_store %arg8[%c0_17, %c0_18], %22 {strides = array<i32>} : memref<8x2xf32, #tpu.memory_space<vmem>>, vector<8x2xf32>,
    return
  }
  func.func @transform_0(%arg0: i32) -> (i32, i32) {
    %c0_i32 = arith.constant 0 : i32
    %c0_i32_0 = arith.constant 0 : i32
    return %arg0, %c0_i32 : i32, i32
  }
  func.func @transform_1(%arg0: i32) -> (i32, i32) {
    %c0_i32 = arith.constant 0 : i32
    %c0_i32_0 = arith.constant 0 : i32
    %c0_i32_1 = arith.constant 0 : i32
    return %c0_i32, %c0_i32_0 : i32, i32
  }
  func.func @transform_2(%arg0: i32) -> (i32, i32) {
    %c0_i32 = arith.constant 0 : i32
    %c0_i32_0 = arith.constant 0 : i32
    %c0_i32_1 = arith.constant 0 : i32
    return %c0_i32, %c0_i32_0 : i32, i32
  }
  func.func @transform_3(%arg0: i32) -> (i32, i32) {
    %c0_i32 = arith.constant 0 : i32
    %c0_i32_0 = arith.constant 0 : i32
    %c0_i32_1 = arith.constant 0 : i32
    return %c0_i32, %c0_i32_0 : i32, i32
  }
  func.func @transform_4(%arg0: i32) -> (i32, i32) {
    %c0_i32 = arith.constant 0 : i32
    %c0_i32_0 = arith.constant 0 : i32
    %c0_i32_1 = arith.constant 0 : i32
    return %c0_i32, %c0_i32_0 : i32, i32
  }
  func.func @transform_5(%arg0: i32) -> (i32, i32) {
    %c0_i32 = arith.constant 0 : i32
    %c0_i32_0 = arith.constant 0 : i32
    %c0_i32_1 = arith.constant 0 : i32
    return %c0_i32, %c0_i32_0 : i32, i32
  }
  func.func @transform_6(%arg0: i32) -> (i32, i32) {
    %c0_i32 = arith.constant 0 : i32
    %c0_i32_0 = arith.constant 0 : i32
    %c0_i32_1 = arith.constant 0 : i32
    return %c0_i32, %c0_i32_0 : i32, i32
  }
  func.func @transform_7(%arg0: i32) -> (i32, i32) {
    %c0_i32 = arith.constant 0 : i32
    %c0_i32_0 = arith.constant 0 : i32
    return %arg0, %c0_i32 : i32, i32
  }
}

</mosaic_0001>

<bundles_post_ra>
// kernel: net_forward.1
= control target key start
LH: loop header
LB: loop body
LE: loop exit
PB: predicated region body
PF: predicated region fallthrough
CT: control target
= control target key end

     0   :  { %vm41_vm0 = vcmask 1041408   ;;  %v421_v0 = vmov 0.0   ;;  %vm422_vm1 = vmmov 0   ;;  %vm37_vm2 = vcmask 31744   ;;  %s552_s1 = inlined_call_operand.vmem [shape: bf16[4,128], index: 1, kind: input, shape index: {}]   ;;  %s553_s0 = inlined_call_operand.vmem [shape: f32[8,4], index: 0, kind: input, shape index: {}]   ;;  %s554_s3 = inlined_call_operand.vmem [shape: bf16[128,128], index: 3, kind: input, shape index: {}]   ;;  %s555_s5 = inlined_call_operand.vmem [shape: bf16[128,2], index: 5, kind: input, shape index: {}]   ;;  %s556_s2 = inlined_call_operand.vmem [shape: f32[1,128], index: 2, kind: input, shape index: {}]   ;;  %s557_s4 = inlined_call_operand.vmem [shape: f32[1,128], index: 4, kind: input, shape index: {}]   ;;  %s558_s6 = inlined_call_operand.vmem [shape: f32[1,2], index: 6, kind: input, shape index: {}]   ;;  %s559_s7 = inlined_call_operand.vmem [shape: f32[8,2], index: 7, kind: output, shape index: {}]  }
   0x1   :  { %357 = vmatprep.subr.bf16.mxu0 %v421_v0  ;;  %v29_v1 = vld [vmem:[%s552_s1] sm:$0x3]  ;;  %359 = vmatprep.mubr.msk.bf16.mxu0 %vm422_vm1, %v421_v0  ;;  %v406_v6 = vld [vmem:[%s554_s3 + $0x8] sm:$0xff]   ;;  %v407_v7 = vld [vmem:[%s554_s3 + $0x10] sm:$0xff]   ;;  %vm311_vm3 = vcmask 15360  }
   0x2   :  { %v27_v2 = vld [vmem:[%s553_s0] sm:$0xff]  ;;  %v43_v3 = vsel %vm41_vm0, %v29_v1, 0  ;;  %363 = vmatprep.subr.bf16.mxu1 %v421_v0  ;;  %379 = vmatprep.mubr.msk.bf16.mxu1 %vm422_vm1, %v421_v0  ;;  %v408_v8 = vld [vmem:[%s554_s3 + $0x18] sm:$0xff]   ;;  %v410_v10 = vld [vmem:[%s554_s3 + $0x28] sm:$0xff]  }
   0x3   :  { %v28_v4 = vpack.c.bf16 %v27_v2, %v27_v2  ;;  %v405_v5 = vld [vmem:[%s554_s3] sm:$0xff]   ;;  %358 = vmatpush3.bf16.msra.mxu0 %v43_v3  ;;  %v411_v11 = vld [vmem:[%s554_s3 + $0x30] sm:$0xff]   ;;  %v412_v12 = vld [vmem:[%s554_s3 + $0x38] sm:$0xff]  }
   0x4   :  { %364 = vmatpush3.bf16.msra.mxu1 %v405_v5  ;;  %383 = vmatprep.subr.bf16.mxu0 %v421_v0  ;;  %v409_v9 = vld [vmem:[%s554_s3 + $0x20] sm:$0xff]   ;;  %v414_v14 = vld [vmem:[%s555_s5 + $0x8] sm:$0xff]   ;;  %v415_v15 = vld [vmem:[%s555_s5 + $0x10] sm:$0xff]  }
   0x5   :  { %365 = vmatprep.subr.bf16.mxu1 %v421_v0  ;;  %v413_v13 = vld [vmem:[%s555_s5] sm:$0xff]   ;;  %v416_v16 = vld [vmem:[%s555_s5 + $0x18] sm:$0xff]   ;;  %v418_v18 = vld [vmem:[%s555_s5 + $0x28] sm:$0xff]  }
   0x6   :  { %360 = vmatmul.mubr.msk.bf16.vlgmr.msra.gmra.mrb[0].mxu0 %vm37_vm2, %v28_v4  ;;  %v417_v17 = vld [vmem:[%s555_s5 + $0x20] sm:$0xff]   ;;  %v419_v27 = vld [vmem:[%s555_s5 + $0x30] sm:$0xff]   ;;  %v420_v28 = vld [vmem:[%s555_s5 + $0x38] sm:$0xff]  }
   0x7   :  { %399 = vmatprep.mubr.msk.bf16.mxu0 %vm422_vm1, %v421_v0  ;;  %384 = vmatpush3.bf16.msra.mxu0 %v413_v13  ;;  %v317_v19 = vld [vmem:[%s556_s2] ss:$0 sm:$0xff] }
   0x8   :  { %366 = vmatpush3.bf16.msra.mxu1 %v406_v6  ;;  %385 = vmatprep.subr.bf16.mxu0 %v421_v0  ;;  %v319_v29 = vld [vmem:[%s557_s4] ss:$0 sm:$0xff] }
   0x9   :  { %367 = vmatprep.subr.bf16.mxu1 %v421_v0  ;;  %v328_v37 = vld [vmem:[%s558_s6] ss:$0 sm:$0xff] }
   0xb   :  { %386 = vmatpush3.bf16.msra.mxu0 %v414_v14 }
   0xc   :  { %368 = vmatpush3.bf16.msra.mxu1 %v407_v7  ;;  %387 = vmatprep.subr.bf16.mxu0 %v421_v0 }
   0xd   :  { %369 = vmatprep.subr.bf16.mxu1 %v421_v0 }
   0xf   :  { %388 = vmatpush3.bf16.msra.mxu0 %v415_v15 }
  0x10   :  { %370 = vmatpush3.bf16.msra.mxu1 %v408_v8  ;;  %389 = vmatprep.subr.bf16.mxu0 %v421_v0 }
  0x11   :  { %371 = vmatprep.subr.bf16.mxu1 %v421_v0 }
  0x13   :  { %390 = vmatpush3.bf16.msra.mxu0 %v416_v16 }
  0x14   :  { %372 = vmatpush3.bf16.msra.mxu1 %v409_v9  ;;  %391 = vmatprep.subr.bf16.mxu0 %v421_v0 }
  0x15   :  { %373 = vmatprep.subr.bf16.mxu1 %v421_v0 }
  0x17   :  { %392 = vmatpush3.bf16.msra.mxu0 %v417_v17 }
  0x18   :  { %374 = vmatpush3.bf16.msra.mxu1 %v410_v10  ;;  %393 = vmatprep.subr.bf16.mxu0 %v421_v0 }
  0x19   :  { %375 = vmatprep.subr.bf16.mxu1 %v421_v0 }
  0x1b   :  { %394 = vmatpush3.bf16.msra.mxu0 %v418_v18 }
  0x1c   :  { %376 = vmatpush3.bf16.msra.mxu1 %v411_v11  ;;  %395 = vmatprep.subr.bf16.mxu0 %v421_v0 }
  0x1d   :  { %377 = vmatprep.subr.bf16.mxu1 %v421_v0 }
  0x1f   :  { %396 = vmatpush3.bf16.msra.mxu0 %v419_v27 }
  0x20   :  { %378 = vmatpush3.bf16.msra.mxu1 %v412_v12  ;;  %397 = vmatprep.subr.bf16.mxu0 %v421_v0 }
  0x23   :  { %398 = vmatpush3.bf16.msra.mxu0 %v420_v28 }
  0xd9   :  { %v79_v20 = vpop.f32.mrb[0].mxu0 }
  0xda   :  { %v80_v21 = vadd.f32 %v317_v19, %v79_v20  ;;  %v361_v22 = vpop.f32.mrb[1].mxu0 }
  0xdb   :  { %v82_v23 = vpop.f32.mrb[2].mxu0 }
  0xdc   :  { %v85_v24 = vmax.f32 %v80_v21, 0.0  ;;  %v362_v25 = vpop.f32.mrb[3].mxu0 }
  0xde   :  { %v86_v26 = vpack.c.bf16 %v85_v24, %v85_v24 }
  0xe0   :  { %380 = vmatmul.mubr.bf16.vlgmr.msra.gmra.mrb[0].mxu1 %v86_v26 }
 0x1b3   :  { %v192_v30 = vpop.f32.mrb[0].mxu1 }
 0x1b4   :  { %v193_v31 = vadd.f32 %v319_v29, %v192_v30  ;;  %v381_v32 = vpop.f32.mrb[1].mxu1 }
 0x1b5   :  { %v195_v33 = vpop.f32.mrb[2].mxu1 }
 0x1b6   :  { %v198_v34 = vmax.f32 %v193_v31, 0.0  ;;  %v382_v35 = vpop.f32.mrb[3].mxu1 }
 0x1b8   :  { %v199_v36 = vpack.c.bf16 %v198_v34, %v198_v34 }
 0x1ba   :  { %400 = vmatmul.mubr.bf16.vlgmr.msra.gmra.mrb[4].mxu0 %v199_v36 }
 0x28d   :  { %v305_v38 = vpop.f32.mrb[4].mxu0 }
 0x28e   :  { %v306_v39 = vadd.f32 %v328_v37, %v305_v38  ;;  %v401_v40 = vpop.f32.mrb[5].mxu0 }
 0x28f   :  { %v308_v41 = vpop.f32.mrb[6].mxu0 }
 0x290   :  { %312 = vst.msk [vmem:[%s559_s7] sm:$0xff] %vm311_vm3, %v306_v39  ;;  %v402_v42 = vpop.f32.mrb[7].mxu0 }

</bundles_post_ra>
